<compile_context>
chip_gen: v7x
topology: tpu7x:2x2x1
jax: 0.10.0
libtpu: 0.0.40
codegen_flags: <defaults>
</compile_context>

<pallas_src>
import jax
import jax.numpy as jnp
from jax.experimental import pallas as pl
from jax.experimental.pallas import tpu as pltpu


def _fc_relu_film_kernel(x_ref, wfc_ref, bfc_ref, film_ref, out_ref):
    # x_ref:    (TM, Din)   rows of the flattened (B*S, Din) input
    # wfc_ref:  (Din, H)    full fc weight (grid-invariant)
    # bfc_ref:  (1, H)      fc bias
    # film_ref: (TM, 2H)    packed per-row [scale | shift]  (scale already includes +1)
    # out_ref:  (TM, H)
    H = out_ref.shape[-1]

    # fc (MXU, f32 accumulation) + bias + ReLU (VPU, f32)
    h = jnp.dot(x_ref[...], wfc_ref[...], preferred_element_type=jnp.float32)
    h = jnp.maximum(h + bfc_ref[...], 0.0)                       # (TM, H) f32

    # FiLM: out = scale * h + shift   (scale = 1 + gamma precomputed in the wrapper)
    scale = film_ref[:, :H]                                      # (TM, H) f32
    shift = film_ref[:, H:]                                      # (TM, H) f32
    out_ref[...] = (scale * h + shift).astype(out_ref.dtype)


def unet_encoder_block(x, cond, params, *, block_m=256, matmul_dtype=jnp.float32):
    """x: (B, S, Din) f32, cond: (B, C) f32 -> (B, S, H) f32.

    matmul_dtype: dtype of the fc matmul operands fed to the MXU (bf16 recommended on
    v6e/v7x at larger sizes); accumulation and all elementwise math stay f32.
    """
    B, S, Din = x.shape
    H = params["w_fc"].shape[1]
    M = B * S

    # ---- Hoisted FiLM projection: one fused (B, C) @ (C, 2H) matmul in XLA ----
    w_gb = jnp.concatenate([params["w_gamma"], params["w_beta"]], axis=1)   # (C, 2H)
    b_gb = jnp.concatenate([params["b_gamma"], params["b_beta"]], axis=1)   # (1, 2H)
    gb = jnp.dot(cond, w_gb, preferred_element_type=jnp.float32) + b_gb     # (B, 2H)
    scale = gb[:, :H] + 1.0          # fold the FiLM "+1" into the scale
    shift = gb[:, H:]
    film = jnp.concatenate([scale, shift], axis=1)                          # (B, 2H)
    # Expand to per-row of the flattened (B*S) axis: row b*S + s -> batch b.
    film_rows = jnp.repeat(film, S, axis=0).astype(jnp.float32)             # (M, 2H)

    # ---- Flatten B*S into a single M axis for the fc matmul ----
    x2 = x.reshape(M, Din).astype(matmul_dtype)
    w_fc = params["w_fc"].astype(matmul_dtype)
    b_fc = params["b_fc"].astype(jnp.float32)

    tm = M if M <= block_m else block_m
    grid_m = pl.cdiv(M, tm)

    out2 = pl.pallas_call(
        _fc_relu_film_kernel,
        out_shape=jax.ShapeDtypeStruct((M, H), jnp.float32),
        grid_spec=pltpu.PrefetchScalarGridSpec(
            num_scalar_prefetch=0,
            grid=(grid_m,),
            in_specs=[
                pl.BlockSpec((tm, Din), lambda m: (m, 0)),     # x rows
                pl.BlockSpec((Din, H), lambda m: (0, 0)),      # w_fc (grid-invariant)
                pl.BlockSpec((1, H), lambda m: (0, 0)),        # b_fc (grid-invariant)
                pl.BlockSpec((tm, 2 * H), lambda m: (m, 0)),   # packed [scale | shift]
            ],
            out_specs=pl.BlockSpec((tm, H), lambda m: (m, 0)),
        ),
        compiler_params=pltpu.CompilerParams(
            dimension_semantics=("parallel",)),
    )(x2, w_fc, b_fc, film_rows)

    return out2.reshape(B, S, H)


def init_params(key, input_dim, hidden_dim, cond_dim):
    """Deterministic synthetic parameters (same shapes as the PyTorch module,
    Linear weights stored transposed as (in, out))."""
    ks = jax.random.split(key, 6)
    scale_fc = 1.0 / jnp.sqrt(input_dim)
    scale_c = 1.0 / jnp.sqrt(cond_dim)
    return {
        "w_fc":    jax.random.normal(ks[0], (input_dim, hidden_dim), jnp.float32) * scale_fc,
        "b_fc":    jax.random.normal(ks[1], (1, hidden_dim), jnp.float32) * 0.01,
        "w_gamma": jax.random.normal(ks[2], (cond_dim, hidden_dim), jnp.float32) * scale_c,
        "b_gamma": jax.random.normal(ks[3], (1, hidden_dim), jnp.float32) * 0.01,
        "w_beta":  jax.random.normal(ks[4], (cond_dim, hidden_dim), jnp.float32) * scale_c,
        "b_beta":  jax.random.normal(ks[5], (1, hidden_dim), jnp.float32) * 0.01,
    }


def reference(x, cond, p):
    h = jnp.maximum(jnp.einsum("bsd,dh->bsh", x, p["w_fc"]) + p["b_fc"][None], 0.0)
    gamma = (cond @ p["w_gamma"] + p["b_gamma"])[:, None, :]
    beta = (cond @ p["w_beta"] + p["b_beta"])[:, None, :]
    return (1.0 + gamma) * h + beta


if __name__ == "__main__":
    B, S, INPUT_DIM, HIDDEN_DIM, COND_DIM = 2, 8, 32, 128, 64

    key = jax.random.PRNGKey(0)
    kx, kc, kp = jax.random.split(key, 3)
    x = jax.random.normal(kx, (B, S, INPUT_DIM), jnp.float32)
    cond = jax.random.normal(kc, (B, COND_DIM), jnp.float32)
    params = init_params(kp, INPUT_DIM, HIDDEN_DIM, COND_DIM)

    ref = reference(x, cond, params)

    # f32 MXU operands: exact path, tight tolerance.
    out = unet_encoder_block(x, cond, params)
    out = jax.block_until_ready(out)
    assert out.shape == (B, S, HIDDEN_DIM)
    assert jnp.allclose(out, ref, atol=1e-4, rtol=1e-4), "f32 mismatch vs JAX reference"

    # bf16 MXU operands (v6e/v7x fast path), f32 accumulation/elementwise: loose tolerance.
    out_bf16 = unet_encoder_block(x, cond, params, matmul_dtype=jnp.bfloat16)
    out_bf16 = jax.block_until_ready(out_bf16)
    assert jnp.allclose(out_bf16, ref, atol=5e-2, rtol=5e-2), "bf16 mismatch vs JAX reference"

    print("KERNEL_OK")
</pallas_src>

<mosaic_0001>
module attributes {stable_mosaic.version = 11 : i64} {
  func.func @_fc_relu_film_kernel(%arg0: i32, %arg1: memref<16x32xf32, #tpu.memory_space<vmem>>, %arg2: memref<32x128xf32, #tpu.memory_space<vmem>>, %arg3: memref<1x128xf32, #tpu.memory_space<vmem>>, %arg4: memref<16x256xf32, #tpu.memory_space<vmem>>, %arg5: memref<16x128xf32, #tpu.memory_space<vmem>>) attributes {dimension_semantics = [#tpu.dimension_semantics<parallel>], iteration_bounds = array<i64: 1>, scalar_prefetch = 0 : i64, scratch_operands = 0 : i64, tpu.core_type = #tpu.core_type<tc>, window_params = [{transform_indices = @transform_0, window_bounds = array<i64: 16, 32>}, {pipeline_mode = #tpu.pipeline_mode<synchronous>, transform_indices = @transform_1, window_bounds = array<i64: 32, 128>}, {pipeline_mode = #tpu.pipeline_mode<synchronous>, transform_indices = @transform_2, window_bounds = array<i64: 1, 128>}, {transform_indices = @transform_3, window_bounds = array<i64: 16, 256>}, {transform_indices = @transform_4, window_bounds = array<i64: 16, 128>}]} {
    %c0 = arith.constant 0 : index
    %c0_0 = arith.constant 0 : index
    %0 = vector.load %arg1[%c0, %c0_0] : memref<16x32xf32, #tpu.memory_space<vmem>>, vector<16x32xf32>
    %c0_1 = arith.constant 0 : index
    %c0_2 = arith.constant 0 : index
    %1 = vector.load %arg2[%c0_1, %c0_2] : memref<32x128xf32, #tpu.memory_space<vmem>>, vector<32x128xf32>
    %cst = arith.constant dense<0.000000e+00> : vector<16x128xf32>
    %2 = tpu.matmul %0, %1, %cst {dimension_numbers = #tpu.dot_dimension_numbers<[1], [0], [0], [1], [0, 0, 1, 1], [], []>} : vector<16x32xf32>, vector<32x128xf32>, vector<16x128xf32> -> vector<16x128xf32>
    %c0_3 = arith.constant 0 : index
    %c0_4 = arith.constant 0 : index
    %3 = vector.load %arg3[%c0_3, %c0_4] : memref<1x128xf32, #tpu.memory_space<vmem>>, vector<1x128xf32>
    %4 = vector.broadcast %3 : vector<1x128xf32> to vector<16x128xf32>
    %5 = arith.addf %2, %4 : vector<16x128xf32>
    %cst_5 = arith.constant 0.000000e+00 : f32
    %6 = vector.broadcast %cst_5 : f32 to vector<16x128xf32>
    %7 = arith.maximumf %5, %6 : vector<16x128xf32>
    %c0_6 = arith.constant 0 : index
    %c0_7 = arith.constant 0 : index
    %8 = vector.load %arg4[%c0_6, %c0_7] : memref<16x256xf32, #tpu.memory_space<vmem>>, vector<16x128xf32>
    %c0_8 = arith.constant 0 : index
    %c128 = arith.constant 128 : index
    %9 = vector.load %arg4[%c0_8, %c128] : memref<16x256xf32, #tpu.memory_space<vmem>>, vector<16x128xf32>
    %10 = arith.mulf %8, %7 : vector<16x128xf32>
    %11 = arith.addf %10, %9 : vector<16x128xf32>
    %c0_9 = arith.constant 0 : index
    %c0_10 = arith.constant 0 : index
    %12 = vector.load %arg5[%c0_9, %c0_10] : memref<16x128xf32, #tpu.memory_space<vmem>>, vector<16x128xf32>
    tpu.vector_store %arg5[%c0_9, %c0_10], %11 {strides = array<i32>} : memref<16x128xf32, #tpu.memory_space<vmem>>, vector<16x128xf32>,
    return
  }
  func.func @transform_0(%arg0: i32) -> (i32, i32) {
    %c0_i32 = arith.constant 0 : i32
    %c0_i32_0 = arith.constant 0 : i32
    return %arg0, %c0_i32 : i32, i32
  }
  func.func @transform_1(%arg0: i32) -> (i32, i32) {
    %c0_i32 = arith.constant 0 : i32
    %c0_i32_0 = arith.constant 0 : i32
    %c0_i32_1 = arith.constant 0 : i32
    return %c0_i32, %c0_i32_0 : i32, i32
  }
  func.func @transform_2(%arg0: i32) -> (i32, i32) {
    %c0_i32 = arith.constant 0 : i32
    %c0_i32_0 = arith.constant 0 : i32
    %c0_i32_1 = arith.constant 0 : i32
    return %c0_i32, %c0_i32_0 : i32, i32
  }
  func.func @transform_3(%arg0: i32) -> (i32, i32) {
    %c0_i32 = arith.constant 0 : i32
    %c0_i32_0 = arith.constant 0 : i32
    return %arg0, %c0_i32 : i32, i32
  }
  func.func @transform_4(%arg0: i32) -> (i32, i32) {
    %c0_i32 = arith.constant 0 : i32
    %c0_i32_0 = arith.constant 0 : i32
    return %arg0, %c0_i32 : i32, i32
  }
}

</mosaic_0001>

<bundles_post_ra>
// kernel: tpu_custom_call.1
= control target key start
LH: loop header
LB: loop body
LE: loop exit
PB: predicated region body
PF: predicated region fallthrough
CT: control target
= control target key end

     0   :  { %9 = vsyncpa [#allocation3], 0  ;;  %s414_s0 = inlined_call_operand.hbm [shape: f32[16,32], index: 0, kind: input, shape index: {}]   ;;  %s415_s1 = inlined_call_operand.hbm [shape: f32[32,128], index: 1, kind: input, shape index: {}]   ;;  %s416_s2 = inlined_call_operand.vmem [shape: f32[1,128], index: 2, kind: input, shape index: {}]   ;;  %s417_s3 = inlined_call_operand.hbm [shape: f32[16,256], index: 3, kind: input, shape index: {}]   ;;  %s418_s4 = inlined_call_operand.hbm [shape: f32[16,128], index: 4, kind: output, shape index: {}]  }
   0x1   :  { %10 = vsyncpa [#allocation6], 0 }
   0x2   :  { %11 = vsyncpa [#allocation4], 0  ;;  %s314_s15 = smov [#allocation5]   ;;  %s315_s17 = smov [#allocation2]  }
   0x3   :  { %s29_s16 = sshll.u32 %s314_s15, 4  ;;  %s17_s18 = sshll.u32 %s315_s17, 4  ;;  %s30_s16 = int_to_ptr.vmem [resolvable:$true] %s29_s16  ;;  %s347_s18 = int_to_ptr.vmem [resolvable:$true] %s17_s18 }
   0x4   :  { %s220_s21 = scalar_lea.hbm %s415_s1, 512 }
   0x5   :  { %p221_p0 = scmp.ne.s32.totalorder %s415_s1, %s220_s21  ;;  %p224_p1 = scmp.lt.u32.totalorder %s220_s21, %s415_s1 }
   0x7   :  { %p226_p2 = pnand %p224_p1, %p221_p0 }
   0x9   :  { %229 = shalt.err (!%p226_p2)
}
   0xa   :  { %s230_s26 = scalar_lea.vmem %s30_s16, 512  ;;  %p235_p4 = scmp.lt.s32.totalorder %s30_s16, %s30_s16 }
   0xb   :  { %p231_p3 = scmp.ne.s32.totalorder %s30_s16, %s230_s26  ;;  %p236_p5 = scmp.lt.s32.totalorder %s230_s26, %s230_s26 }
   0xd   :  { %p237_p6 = por %p236_p5, %p235_p4 }
   0xf   :  { %p238_p7 = pnand %p237_p6, %p231_p3 }
  0x11   :  { %241 = shalt.err (!%p238_p7)
}
  0x12   :  { %s316_s27 = smov 128   ;;  %s317_s28 = smov 8  }
  0x13   :  { %35 = dma.hbm_to_vmem [thread:$0]  %s415_s1, 512, %s30_s16, [#allocation6], %s316_s27, %s316_s27, %s317_s28  }
  0x14   :  { %s242_s7 = scalar_lea.hbm %s414_s0, 256 }
  0x15   :  { %p243_p8 = scmp.ne.s32.totalorder %s414_s0, %s242_s7  ;;  %p246_p9 = scmp.lt.u32.totalorder %s242_s7, %s414_s0 }
  0x17   :  { %p248_p10 = pnand %p246_p9, %p243_p8 }
  0x19   :  { %251 = shalt.err (!%p248_p10)
}
  0x1a   :  { %s252_s12 = scalar_lea.vmem %s347_s18, 256  ;;  %p257_p12 = scmp.lt.s32.totalorder %s347_s18, %s347_s18 }
  0x1b   :  { %p253_p11 = scmp.ne.s32.totalorder %s347_s18, %s252_s12  ;;  %p258_p13 = scmp.lt.s32.totalorder %s252_s12, %s252_s12 }
  0x1d   :  { %p259_p0 = por %p258_p13, %p257_p12 }
  0x1f   :  { %p260_p1 = pnand %p259_p0, %p253_p11 }
  0x21   :  { %263 = shalt.err (!%p260_p1)
}
  0x22   :  { %23 = dma.hbm_to_vmem [thread:$0]  %s414_s0, 256, %s347_s18, [#allocation3], %s316_s27, %s316_s27, %s317_s28  }
  0x23   :  { %s318_s14 = smov [#allocation7]   ;;  %s264_s19 = scalar_lea.hbm %s417_s3, 512 }
  0x24   :  { %s43_s15 = sshll.u32 %s318_s14, 4  ;;  %p265_p2 = scmp.ne.s32.totalorder %s417_s3, %s264_s19  ;;  %s44_s15 = int_to_ptr.vmem [resolvable:$true] %s43_s15 }
  0x25   :  { %p268_p3 = scmp.lt.u32.totalorder %s264_s19, %s417_s3 }
  0x27   :  { %p270_p4 = pnand %p268_p3, %p265_p2 }
  0x29   :  { %273 = shalt.err (!%p270_p4)
}
  0x2a   :  { %s274_s24 = scalar_lea.vmem %s44_s15, 512  ;;  %p279_p6 = scmp.lt.s32.totalorder %s44_s15, %s44_s15 }
  0x2b   :  { %p275_p5 = scmp.ne.s32.totalorder %s44_s15, %s274_s24  ;;  %p280_p7 = scmp.lt.s32.totalorder %s274_s24, %s274_s24 }
  0x2d   :  { %p281_p8 = por %p280_p7, %p279_p6 }
  0x2f   :  { %p282_p9 = pnand %p281_p8, %p275_p5 }
  0x31   :  { %285 = shalt.err (!%p282_p9)
}
  0x32   :  { %s319_s0 = smov 256   ;;  %s320_s18 = smov 16  }
  0x33   :  { %49 = dma.hbm_to_vmem [thread:$0]  %s417_s3, 512, %s44_s15, [#allocation6], %s319_s0, %s319_s0, %s320_s18  }
  0x34   :  { %308 = dma.done.wait [#allocation3], 256  }
  0x35   :  { %309 = vsyncadd [#allocation3], 4294967040 }
  0x36   :  { %310 = dma.done.wait [#allocation6], 1024  }
  0x37   :  { %311 = vsyncadd [#allocation6], 4294966272  ;;  %vm72_vm0 = vcmask 261120   ;;  %v61_v0 = vld [vmem:[#allocation5] sm:$0xff]  ;;  %v62_v1 = vld [vmem:[#allocation5 + $0x8] sm:$0xff]  ;;  %s321_s30 = smov [#allocation8]  }
  0x38   :  { %v63_v2 = vld [vmem:[#allocation5 + $0x10] sm:$0xff]  ;;  %v204_v3 = vpack.c.bf16 %v62_v1, %v61_v0  ;;  %v64_v4 = vld [vmem:[#allocation5 + $0x18] sm:$0xff]  ;;  %v156_v15 = vld [vmem:[#allocation7] sm:$0xff]  ;;  %s171_s5 = sshll.u32 %s321_s30, 4  ;;  %s172_s5 = int_to_ptr.vmem [resolvable:$true] %s171_s5 }
  0x39   :  { %v59_v5 = vld [vmem:[#allocation2] sm:$0xff]  ;;  %v208_v6 = vpack.c.bf16 %v64_v4, %v63_v2  ;;  %v60_v7 = vld [vmem:[#allocation2 + $0x8] sm:$0xff]  ;;  %v158_v19 = vld [vmem:[#allocation7 + $0x8] sm:$0xff]  ;;  %p291_p11 = scmp.lt.s32.totalorder %s172_s5, %s172_s5 }
  0x3a   :  { %201 = vmatprep.mubr.msk.f32.mxu0 %vm72_vm0, %v59_v5  ;;  %205 = vmatprep.subr.bf16.mxu0 %v204_v3  ;;  %v184_v8 = vld [vmem:[%s416_s2] ss:$0 sm:$0xff]  ;;  %v159_v16 = vld [vmem:[#allocation7 + $0x18] sm:$0xff]  ;;  %s286_s2 = scalar_lea.vmem %s172_s5, 256 }
  0x3b   :  { %207 = vmatpush3.bf16.msra.mxu0 %v204_v3  ;;  %v157_v12 = vld [vmem:[#allocation7 + $0x10] sm:$0xff]  ;;  %p287_p10 = scmp.ne.s32.totalorder %s172_s5, %s286_s2  ;;  %p292_p12 = scmp.lt.s32.totalorder %s286_s2, %s286_s2 }
  0x3c   :  { %209 = vmatprep.subr.bf16.mxu0 %v208_v6 }
  0x3d   :  { %p293_p13 = por %p292_p12, %p291_p11 }
  0x3f   :  { %211 = vmatpush3.bf16.msra.mxu0 %v208_v6  ;;  %p294_p0 = pnand %p293_p13, %p287_p10 }
  0x42   :  { %202 = vmatmul.mubr.msk.f32.vlgmr.msra.gmra.mrb[0].mxu0 %vm72_vm0, %v60_v7 }
 0x115   :  { %v203_v9 = vpop.f32.mrb[0].mxu0 }
 0x116   :  { %v151_v10 = vadd.f32 %v203_v9, %v184_v8  ;;  %v145_v11 = vpop.f32.mrb[1].mxu0 }
 0x117   :  { %v146_v13 = vadd.f32 %v184_v8, %v145_v11 }
 0x118   :  { %v155_v14 = vmax.f32 %v151_v10, 0.0 }
 0x119   :  { %v154_v17 = vmax.f32 %v146_v13, 0.0 }
 0x11a   :  { %v161_v18 = vmul.f32 %v157_v12, %v155_v14 }
 0x11b   :  { %v160_v20 = vmul.f32 %v156_v15, %v154_v17 }
 0x11c   :  { %v163_v21 = vadd.f32 %v161_v18, %v159_v16 }
 0x11d   :  { %v162_v22 = vadd.f32 %v160_v20, %v158_v19 }
 0x11e   :  { %165 = vst [vmem:[#allocation8 + $0x8] sm:$0xff] %v163_v21 }
 0x11f   :  { %164 = vst [vmem:[#allocation8] sm:$0xff] %v162_v22 }
 0x120   :  { %297 = shalt.err (!%p294_p0)
}
 0x121   :  { %s298_s8 = scalar_lea.hbm %s418_s4, 256 }
 0x122   :  { %p299_p1 = scmp.ne.s32.totalorder %s418_s4, %s298_s8  ;;  %p302_p2 = scmp.lt.u32.totalorder %s298_s8, %s418_s4 }
 0x124   :  { %p304_p3 = pnand %p302_p2, %p299_p1 }
 0x126   :  { %307 = shalt.err (!%p304_p3)
}
 0x127   :  { %177 = dma.vmem_to_hbm [thread:$0]  %s172_s5, 256, %s418_s4, [#allocation4], %s316_s27, %s316_s27, %s317_s28  }
 0x128   :  { %312 = dma.done.wait [#allocation4], 256  }
 0x129   :  { %313 = vsyncadd [#allocation4], 4294967040 }
 0x12a   :  { %181 = vsyncpa [#allocation3], 1 }
 0x12b   :  { %182 = vsyncpa [#allocation6], 1 }
 0x12c   :  { %183 = vsyncpa [#allocation4], 1 }

</bundles_post_ra>
